<compile_context>
chip_gen: v6e
topology: v6e:2x2x1
jax: 0.10.0
libtpu: 0.0.40
codegen_flags: <defaults>
</compile_context>

<pallas_src>
import math
import functools

import jax
import jax.numpy as jnp
import numpy as np
from jax.experimental import pallas as pl
from jax.experimental.pallas import tpu as pltpu

NUM_DIR_BINS = 12
BN_EPS = 1e-5
OUT_PAD = 128  # lane-dense packed output width ([loc(3) | dir(12) | zeros])


# ----------------------------------------------------------------------------
# Kernel
# ----------------------------------------------------------------------------
def _rot_head_kernel(
    x_ref,    # (TB, C*HW)   flattened input features (lane-dense)
    w0_ref,   # (C*HW, Csh)  pool + shared conv + BN folded into one matrix
    b0_ref,   # (1, Csh)     shared BN shift
    w1_ref,   # (Csh, Cl+Cd) fused loc|dir hidden weight, BN folded
    b1_ref,   # (1, Cl+Cd)   fused loc|dir hidden shift
    w2_ref,   # (Cl+Cd, 128) block-diagonal [w_loc 0; 0 w_dir], zero-padded
    b2_ref,   # (1, 128)     [b_loc | b_dir | 0...]
    out_ref,  # (TB, 128)    packed [loc_score | dir_pred | 0...]
):
    x = x_ref[...]

    # AdaptiveAvgPool2d((1,1)) + shared Conv1d(k=1) + folded BN, fused:
    # W0[c*HW + s, :] == W_shared[c, :] / HW  ->  x2d @ W0 == pooled @ W_shared
    h = jnp.dot(x, w0_ref[...], preferred_element_type=jnp.float32)
    h = jnp.maximum(h + b0_ref[...], 0.0)                     # shared ReLU

    # fused loc|dir hidden layer: Conv1d(k=1) + folded BN + ReLU
    h1 = jnp.dot(h, w1_ref[...], preferred_element_type=jnp.float32)
    h1 = jnp.maximum(h1 + b1_ref[...], 0.0)

    # fused, zero-padded output layer: [loc_score | dir_pred | zeros]
    out = jnp.dot(h1, w2_ref[...], preferred_element_type=jnp.float32)
    out_ref[...] = out + b2_ref[...]


# ----------------------------------------------------------------------------
# Wrapper
# ----------------------------------------------------------------------------
@functools.lru_cache(maxsize=1)
def _vmem_capacity_bytes():
    """Physical VMEM of the attached TPU; conservative fallback = v7x (64 MiB)."""
    try:
        info = pltpu.get_tpu_info()
        cap = getattr(info, "vmem_capacity_bytes", None)
        if cap:
            return int(cap)
    except Exception:
        pass
    return 64 * 1024 * 1024


def _fold_bn(w, gamma, beta, mean, var, eps=BN_EPS):
    """Fold eval-mode BN1d into a preceding bias-less Conv1d(k=1): exact."""
    scale = gamma / jnp.sqrt(var + eps)                 # (1, Cout)
    w_f = (w * scale).astype(jnp.float32)               # (Cin, Cout)
    b_f = (beta - scale * mean).astype(jnp.float32)     # (1, Cout)
    return w_f, b_f


def rot_head_forward(x_nchw, params, num_dir_bins=NUM_DIR_BINS):
    """x_nchw: (B, C, H, W).  Returns dict with loc_score/dir_class/dir_res_norm/dir_res."""
    B, C, H, W = x_nchw.shape
    HW = H * W
    CHW = C * HW
    # Row-major flatten (B,C,H,W)->(B,C*HW): zero data movement, lane-dense last dim.
    x2d = x_nchw.reshape(B, CHW)

    # --- Fold eval-mode BatchNorm into conv weights / shifts (exact) ---
    w_sh_f, b_sh_f = _fold_bn(params["w_sh"], params["bn_sh_g"], params["bn_sh_b"],
                              params["bn_sh_m"], params["bn_sh_v"])
    w_loc1_f, b_loc1_f = _fold_bn(params["w_loc1"], params["bn_loc_g"], params["bn_loc_b"],
                                  params["bn_loc_m"], params["bn_loc_v"])
    w_dir1_f, b_dir1_f = _fold_bn(params["w_dir1"], params["bn_dir_g"], params["bn_dir_b"],
                                  params["bn_dir_m"], params["bn_dir_v"])

    # --- Fold AdaptiveAvgPool2d((1,1)) into the shared conv ---
    # x2d[:, c*HW + s] == x[:, c, s]  =>  W0[c*HW + s, :] = w_sh_f[c, :] / HW
    w0 = (jnp.repeat(w_sh_f, HW, axis=0) / float(HW)).astype(jnp.float32)  # (C*HW, Csh)

    # --- Fuse loc / dir hidden layers ---
    w1 = jnp.concatenate([w_loc1_f, w_dir1_f], axis=1).astype(jnp.float32)  # (Csh, Cl+Cd)
    b1 = jnp.concatenate([b_loc1_f, b_dir1_f], axis=1).astype(jnp.float32)  # (1, Cl+Cd)

    # --- Block-diagonal output layer, zero-padded to a 128-lane-dense block ---
    Cl, num_loc_out = params["w_loc"].shape
    Cd, num_dir_out = params["w_dir"].shape
    n_out = num_loc_out + num_dir_out
    w2 = jnp.zeros((Cl + Cd, OUT_PAD), jnp.float32)
    w2 = w2.at[:Cl, :num_loc_out].set(params["w_loc"])
    w2 = w2.at[Cl:, num_loc_out:n_out].set(params["w_dir"])
    b2 = jnp.zeros((1, OUT_PAD), jnp.float32)
    b2 = b2.at[:, :num_loc_out].set(params["b_loc"])
    b2 = b2.at[:, num_loc_out:n_out].set(params["b_dir"])

    # --- Generation-aware batch tiling ---
    # x is the only large array and it is double-buffered by the BlockSpec
    # pipeline; give each buffer ~1/4 of physical VMEM and set the scoped
    # limit explicitly (v5e defaults to 16 MiB, far below what we want).
    vmem_cap = _vmem_capacity_bytes()
    per_buf = vmem_cap // 4
    row_bytes = CHW * x2d.dtype.itemsize
    tb_cap = max(8, (per_buf // max(row_bytes, 1)) // 8 * 8)
    # Target >= 2 grid steps so the "parallel" batch axis can shard across
    # v7x's two TensorCores (harmless on 1-TC v5e/v6e).
    tb_target = max(8, ((-(-B // 2)) + 7) // 8 * 8)
    TB = min(tb_cap, tb_target)
    if TB >= B:
        TB = B  # single full-array block (block dims equal array dims)
    grid = (pl.cdiv(B, TB),)

    vmem_limit = int(min(vmem_cap - 2 * 1024 * 1024,
                         2 * per_buf + 8 * 1024 * 1024))

    def fixed(arr):  # whole-array weight block, resident across all grid steps
        shape = arr.shape
        return pl.BlockSpec(shape, lambda b, _s=shape: (0,) * len(_s))

    packed = pl.pallas_call(
        _rot_head_kernel,
        out_shape=jax.ShapeDtypeStruct((B, OUT_PAD), jnp.float32),
        grid=grid,
        in_specs=[
            pl.BlockSpec((TB, CHW), lambda b: (b, 0)),
            fixed(w0), fixed(b_sh_f), fixed(w1), fixed(b1), fixed(w2), fixed(b2),
        ],
        out_specs=pl.BlockSpec((TB, OUT_PAD), lambda b: (b, 0)),
        compiler_params=pltpu.CompilerParams(
            dimension_semantics=("parallel",),
            vmem_limit_bytes=vmem_limit),
    )(x2d, w0, b_sh_f, w1, b1, w2, b2)

    # --- Cheap slicing / scaling in the wrapper (trivial XLA ops) ---
    half = num_dir_bins // 2
    loc_score = packed[:, :num_loc_out]
    dir_class = packed[:, num_loc_out:num_loc_out + half]
    dir_res_norm = packed[:, num_loc_out + half:num_loc_out + 2 * half]
    dir_res = dir_res_norm * (math.pi / num_dir_bins)

    return {
        "loc_score": loc_score,
        "dir_class": dir_class,
        "dir_res_norm": dir_res_norm,
        "dir_res": dir_res,
    }


# ----------------------------------------------------------------------------
# Pure-JAX reference (mirrors the PyTorch forward, eval-mode BN)
# ----------------------------------------------------------------------------
def rot_head_reference(x_nchw, params, num_dir_bins=NUM_DIR_BINS):
    B, C, H, W = x_nchw.shape
    pooled = jnp.mean(x_nchw.reshape(B, C, H * W), axis=-1)     # AdaptiveAvgPool2d(1,1)

    def bn(z, g, b, m, v):
        return (z - m) / jnp.sqrt(v + BN_EPS) * g + b

    h = jnp.maximum(bn(pooled @ params["w_sh"], params["bn_sh_g"], params["bn_sh_b"],
                       params["bn_sh_m"], params["bn_sh_v"]), 0.0)
    hl = jnp.maximum(bn(h @ params["w_loc1"], params["bn_loc_g"], params["bn_loc_b"],
                        params["bn_loc_m"], params["bn_loc_v"]), 0.0)
    loc_score = hl @ params["w_loc"] + params["b_loc"]
    hd = jnp.maximum(bn(h @ params["w_dir1"], params["bn_dir_g"], params["bn_dir_b"],
                        params["bn_dir_m"], params["bn_dir_v"]), 0.0)
    dir_pred = hd @ params["w_dir"] + params["b_dir"]
    half = num_dir_bins // 2
    dir_res_norm = dir_pred[:, half:2 * half]
    return {
        "loc_score": loc_score,
        "dir_class": dir_pred[:, :half],
        "dir_res_norm": dir_res_norm,
        "dir_res": dir_res_norm * (math.pi / num_dir_bins),
    }


# ----------------------------------------------------------------------------
# Deterministic synthetic parameters
# ----------------------------------------------------------------------------
def init_params(key, in_channels=4, shared=32, loc_hidden=32, dir_hidden=32,
                num_loc_out=3, num_dir_out=12, std=0.1):
    """Conv1d weights stored as (Cin, Cout) so the kernel computes x @ W.

    ConvModule conv layers use bias='auto' -> no conv bias (BN follows);
    conv_loc / conv_dir have biases.  BN uses gamma=1 / beta=0 (init_weights
    defaults) but nonzero running stats so the exact eval-mode fold
    (beta - gamma*mean/sqrt(var+eps)) is genuinely exercised.
    """
    ks = jax.random.split(key, 12)
    f32 = jnp.float32

    def nrm(k, shape, s=std):
        return (s * jax.random.normal(k, shape)).astype(f32)

    def bn(km, kv, cout):
        return {
            "g": jnp.ones((1, cout), f32),
            "b": jnp.zeros((1, cout), f32),
            "m": nrm(km, (1, cout), 0.05),
            "v": (jnp.ones((1, cout), f32) + jnp.abs(nrm(kv, (1, cout), 0.1))),
        }

    bn_sh = bn(ks[6], ks[7], shared)
    bn_loc = bn(ks[8], ks[9], loc_hidden)
    bn_dir = bn(ks[10], ks[11], dir_hidden)

    return {
        "w_sh":   nrm(ks[0], (in_channels, shared)),
        "bn_sh_g": bn_sh["g"], "bn_sh_b": bn_sh["b"], "bn_sh_m": bn_sh["m"], "bn_sh_v": bn_sh["v"],
        "w_loc1": nrm(ks[1], (shared, loc_hidden)),
        "bn_loc_g": bn_loc["g"], "bn_loc_b": bn_loc["b"], "bn_loc_m": bn_loc["m"], "bn_loc_v": bn_loc["v"],
        "w_loc":  nrm(ks[2], (loc_hidden, num_loc_out)),
        "b_loc":  nrm(ks[3], (1, num_loc_out)),
        "w_dir1": nrm(ks[4], (shared, dir_hidden)),
        "bn_dir_g": bn_dir["g"], "bn_dir_b": bn_dir["b"], "bn_dir_m": bn_dir["m"], "bn_dir_v": bn_dir["v"],
        "w_dir":  nrm(ks[5], (dir_hidden, num_dir_out)),
        "b_dir":  jnp.zeros((1, num_dir_out), f32),
    }


if __name__ == "__main__":
    key = jax.random.PRNGKey(0)
    k_x, k_p = jax.random.split(key)

    B, C, H, W = 2, 4, 16, 16
    x = jax.random.normal(k_x, (B, C, H, W), dtype=jnp.float32)
    params = init_params(k_p, in_channels=C)

    results = jax.jit(rot_head_forward)(x, params)
    jax.block_until_ready(results)

    assert results["loc_score"].shape == (B, 3)
    assert results["dir_class"].shape == (B, 6)
    assert results["dir_res_norm"].shape == (B, 6)
    assert results["dir_res"].shape == (B, 6)

    # Numeric check against a pure-JAX mirror of the PyTorch forward.
    ref = jax.jit(rot_head_reference)(x, params)
    jax.block_until_ready(ref)
    for name in ("loc_score", "dir_class", "dir_res_norm", "dir_res"):
        np.testing.assert_allclose(np.asarray(results[name]), np.asarray(ref[name]),
                                   rtol=1e-4, atol=1e-5)

    print("KERNEL_OK")
</pallas_src>

<mosaic_0001>
module attributes {stable_mosaic.version = 11 : i64} {
  func.func @_rot_head_kernel(%arg0: i32, %arg1: memref<2x1024xf32, #tpu.memory_space<vmem>>, %arg2: memref<1024x32xf32, #tpu.memory_space<vmem>>, %arg3: memref<1x32xf32, #tpu.memory_space<vmem>>, %arg4: memref<32x64xf32, #tpu.memory_space<vmem>>, %arg5: memref<1x64xf32, #tpu.memory_space<vmem>>, %arg6: memref<64x128xf32, #tpu.memory_space<vmem>>, %arg7: memref<1x128xf32, #tpu.memory_space<vmem>>, %arg8: memref<2x128xf32, #tpu.memory_space<vmem>>) attributes {dimension_semantics = [#tpu.dimension_semantics<parallel>], iteration_bounds = array<i64: 1>, scalar_prefetch = 0 : i64, scratch_operands = 0 : i64, tpu.core_type = #tpu.core_type<tc>, window_params = [{transform_indices = @transform_0, window_bounds = array<i64: 2, 1024>}, {pipeline_mode = #tpu.pipeline_mode<synchronous>, transform_indices = @transform_1, window_bounds = array<i64: 1024, 32>}, {pipeline_mode = #tpu.pipeline_mode<synchronous>, transform_indices = @transform_2, window_bounds = array<i64: 1, 32>}, {pipeline_mode = #tpu.pipeline_mode<synchronous>, transform_indices = @transform_3, window_bounds = array<i64: 32, 64>}, {pipeline_mode = #tpu.pipeline_mode<synchronous>, transform_indices = @transform_4, window_bounds = array<i64: 1, 64>}, {pipeline_mode = #tpu.pipeline_mode<synchronous>, transform_indices = @transform_5, window_bounds = array<i64: 64, 128>}, {pipeline_mode = #tpu.pipeline_mode<synchronous>, transform_indices = @transform_6, window_bounds = array<i64: 1, 128>}, {transform_indices = @transform_7, window_bounds = array<i64: 2, 128>}]} {
    %c0 = arith.constant 0 : index
    %c0_0 = arith.constant 0 : index
    %0 = vector.load %arg1[%c0, %c0_0] : memref<2x1024xf32, #tpu.memory_space<vmem>>, vector<2x1024xf32>
    %c0_1 = arith.constant 0 : index
    %c0_2 = arith.constant 0 : index
    %1 = vector.load %arg2[%c0_1, %c0_2] : memref<1024x32xf32, #tpu.memory_space<vmem>>, vector<1024x32xf32>
    %cst = arith.constant dense<0.000000e+00> : vector<2x32xf32>
    %2 = tpu.matmul %0, %1, %cst {dimension_numbers = #tpu.dot_dimension_numbers<[1], [0], [0], [1], [0, 0, 1, 1], [], []>} : vector<2x1024xf32>, vector<1024x32xf32>, vector<2x32xf32> -> vector<2x32xf32>
    %c0_3 = arith.constant 0 : index
    %c0_4 = arith.constant 0 : index
    %3 = vector.load %arg3[%c0_3, %c0_4] : memref<1x32xf32, #tpu.memory_space<vmem>>, vector<1x32xf32>
    %4 = vector.broadcast %3 : vector<1x32xf32> to vector<2x32xf32>
    %5 = arith.addf %2, %4 : vector<2x32xf32>
    %cst_5 = arith.constant 0.000000e+00 : f32
    %6 = vector.broadcast %cst_5 : f32 to vector<2x32xf32>
    %7 = arith.maximumf %5, %6 : vector<2x32xf32>
    %c0_6 = arith.constant 0 : index
    %c0_7 = arith.constant 0 : index
    %8 = vector.load %arg4[%c0_6, %c0_7] : memref<32x64xf32, #tpu.memory_space<vmem>>, vector<32x64xf32>
    %cst_8 = arith.constant dense<0.000000e+00> : vector<2x64xf32>
    %9 = tpu.matmul %7, %8, %cst_8 {dimension_numbers = #tpu.dot_dimension_numbers<[1], [0], [0], [1], [0, 0, 1, 1], [], []>} : vector<2x32xf32>, vector<32x64xf32>, vector<2x64xf32> -> vector<2x64xf32>
    %c0_9 = arith.constant 0 : index
    %c0_10 = arith.constant 0 : index
    %10 = vector.load %arg5[%c0_9, %c0_10] : memref<1x64xf32, #tpu.memory_space<vmem>>, vector<1x64xf32>
    %11 = vector.broadcast %10 : vector<1x64xf32> to vector<2x64xf32>
    %12 = arith.addf %9, %11 : vector<2x64xf32>
    %cst_11 = arith.constant 0.000000e+00 : f32
    %13 = vector.broadcast %cst_11 : f32 to vector<2x64xf32>
    %14 = arith.maximumf %12, %13 : vector<2x64xf32>
    %c0_12 = arith.constant 0 : index
    %c0_13 = arith.constant 0 : index
    %15 = vector.load %arg6[%c0_12, %c0_13] : memref<64x128xf32, #tpu.memory_space<vmem>>, vector<64x128xf32>
    %cst_14 = arith.constant dense<0.000000e+00> : vector<2x128xf32>
    %16 = tpu.matmul %14, %15, %cst_14 {dimension_numbers = #tpu.dot_dimension_numbers<[1], [0], [0], [1], [0, 0, 1, 1], [], []>} : vector<2x64xf32>, vector<64x128xf32>, vector<2x128xf32> -> vector<2x128xf32>
    %c0_15 = arith.constant 0 : index
    %c0_16 = arith.constant 0 : index
    %17 = vector.load %arg7[%c0_15, %c0_16] : memref<1x128xf32, #tpu.memory_space<vmem>>, vector<1x128xf32>
    %18 = vector.broadcast %17 : vector<1x128xf32> to vector<2x128xf32>
    %19 = arith.addf %16, %18 : vector<2x128xf32>
    %c0_17 = arith.constant 0 : index
    %c0_18 = arith.constant 0 : index
    %20 = vector.load %arg8[%c0_17, %c0_18] : memref<2x128xf32, #tpu.memory_space<vmem>>, vector<2x128xf32>
    tpu.vector_store %arg8[%c0_17, %c0_18], %19 {strides = array<i32>} : memref<2x128xf32, #tpu.memory_space<vmem>>, vector<2x128xf32>,
    return
  }
  func.func @transform_0(%arg0: i32) -> (i32, i32) {
    %c0_i32 = arith.constant 0 : i32
    %c0_i32_0 = arith.constant 0 : i32
    return %arg0, %c0_i32 : i32, i32
  }
  func.func @transform_1(%arg0: i32) -> (i32, i32) {
    %c0_i32 = arith.constant 0 : i32
    %c0_i32_0 = arith.constant 0 : i32
    %c0_i32_1 = arith.constant 0 : i32
    return %c0_i32, %c0_i32_0 : i32, i32
  }
  func.func @transform_2(%arg0: i32) -> (i32, i32) {
    %c0_i32 = arith.constant 0 : i32
    %c0_i32_0 = arith.constant 0 : i32
    %c0_i32_1 = arith.constant 0 : i32
    return %c0_i32, %c0_i32_0 : i32, i32
  }
  func.func @transform_3(%arg0: i32) -> (i32, i32) {
    %c0_i32 = arith.constant 0 : i32
    %c0_i32_0 = arith.constant 0 : i32
    %c0_i32_1 = arith.constant 0 : i32
    return %c0_i32, %c0_i32_0 : i32, i32
  }
  func.func @transform_4(%arg0: i32) -> (i32, i32) {
    %c0_i32 = arith.constant 0 : i32
    %c0_i32_0 = arith.constant 0 : i32
    %c0_i32_1 = arith.constant 0 : i32
    return %c0_i32, %c0_i32_0 : i32, i32
  }
  func.func @transform_5(%arg0: i32) -> (i32, i32) {
    %c0_i32 = arith.constant 0 : i32
    %c0_i32_0 = arith.constant 0 : i32
    %c0_i32_1 = arith.constant 0 : i32
    return %c0_i32, %c0_i32_0 : i32, i32
  }
  func.func @transform_6(%arg0: i32) -> (i32, i32) {
    %c0_i32 = arith.constant 0 : i32
    %c0_i32_0 = arith.constant 0 : i32
    %c0_i32_1 = arith.constant 0 : i32
    return %c0_i32, %c0_i32_0 : i32, i32
  }
  func.func @transform_7(%arg0: i32) -> (i32, i32) {
    %c0_i32 = arith.constant 0 : i32
    %c0_i32_0 = arith.constant 0 : i32
    return %arg0, %c0_i32 : i32, i32
  }
}

</mosaic_0001>

<bundles_post_ra>
// kernel: rot_head_forward.1
= control target key start
LH: loop header
LB: loop body
LE: loop exit
PB: predicated region body
PF: predicated region fallthrough
CT: control target
= control target key end

     0   :  { %v862_v30 = vmov 1983009808   ;;  %v169_v32 = vlaneseq  ;;  %vm864_vm0 = vmmov 0   ;;  %vm499_vm1 = vcmask 261120   ;;  %s1349_s1 = inlined_call_operand.vmem [shape: f32[1024,32], index: 1, kind: input, shape index: {}]   ;;  %s1350_s0 = inlined_call_operand.vmem [shape: f32[2,1024], index: 0, kind: input, shape index: {}]   ;;  %s1351_s3 = inlined_call_operand.vmem [shape: f32[32,64], index: 3, kind: input, shape index: {}]   ;;  %s1352_s5 = inlined_call_operand.vmem [shape: f32[64,128], index: 5, kind: input, shape index: {}]   ;;  %s1353_s2 = inlined_call_operand.vmem [shape: f32[1,32], index: 2, kind: input, shape index: {}]   ;;  %s1354_s4 = inlined_call_operand.vmem [shape: f32[1,64], index: 4, kind: input, shape index: {}]   ;;  %s1355_s6 = inlined_call_operand.vmem [shape: f32[1,128], index: 6, kind: input, shape index: {}]   ;;  %s1356_s7 = inlined_call_operand.vmem [shape: f32[2,128], index: 7, kind: output, shape index: {}]  }
   0x1   :  { %v59_v0 = vld [vmem:[%s1349_s1 + $0xf8] sm:$0xff]  ;;  %v58_v4 = vld [vmem:[%s1349_s1 + $0xf0] sm:$0xff]  ;;  %v57_v8 = vld [vmem:[%s1349_s1 + $0xe8] sm:$0xff]  ;;  %v167_v31 = vunpack.c.l.s4 %v862_v30  ;;  %vm589_vm2 = vcmask 523264  }
   0x2   :  { %v91_v1 = vld [vmem:[%s1349_s1 + $0x1f8] sm:$0xff]  ;;  %673 = vmatprep.subr.mxu0 %v59_v0  ;;  %v90_v5 = vld [vmem:[%s1349_s1 + $0x1f0] sm:$0xff]  ;;  %v89_v9 = vld [vmem:[%s1349_s1 + $0x1e8] sm:$0xff]  ;;  %v170_v42 = vshrl.u32 %v169_v32, 7 }
   0x3   :  { %v43_v2 = vld [vmem:[%s1349_s1 + $0x78] sm:$0xff]  ;;  %708 = vmatprep.subr.mxu1 %v91_v1  ;;  %v42_v6 = vld [vmem:[%s1349_s1 + $0x70] sm:$0xff]  ;;  %v41_v10 = vld [vmem:[%s1349_s1 + $0x68] sm:$0xff]  ;;  %v168_v41 = vunpack.c.0.s8 %v167_v31 }
   0x4   :  { %v75_v3 = vld [vmem:[%s1349_s1 + $0x178] sm:$0xff]  ;;  %674 = vmatpush3.msra.mxu0 %v43_v2  ;;  %v74_v7 = vld [vmem:[%s1349_s1 + $0x170] sm:$0xff]  ;;  %v73_v11 = vld [vmem:[%s1349_s1 + $0x168] sm:$0xff] }
   0x5   :  { %709 = vmatpush3.msra.mxu1 %v75_v3  ;;  %675 = vmatprep.subr.mxu0 %v58_v4  ;;  %v56_v12 = vld [vmem:[%s1349_s1 + $0xe0] sm:$0xff]  ;;  %v55_v16 = vld [vmem:[%s1349_s1 + $0xd8] sm:$0xff]  ;;  %v54_v20 = vld [vmem:[%s1349_s1 + $0xd0] sm:$0xff]  ;;  %v1043_v51 = vsub.s32 %v168_v41, %v170_v42 }
   0x6   :  { %710 = vmatprep.subr.mxu1 %v90_v5  ;;  %676 = vmatpush3.msra.mxu0 %v42_v6  ;;  %v88_v13 = vld [vmem:[%s1349_s1 + $0x1e0] sm:$0xff]  ;;  %v87_v17 = vld [vmem:[%s1349_s1 + $0x1d8] sm:$0xff]  ;;  %v86_v21 = vld [vmem:[%s1349_s1 + $0x1d0] sm:$0xff] }
   0x7   :  { %711 = vmatpush3.msra.mxu1 %v74_v7  ;;  %677 = vmatprep.subr.mxu0 %v57_v8  ;;  %v40_v14 = vld [vmem:[%s1349_s1 + $0x60] sm:$0xff]  ;;  %v39_v18 = vld [vmem:[%s1349_s1 + $0x58] sm:$0xff]  ;;  %v38_v22 = vld [vmem:[%s1349_s1 + $0x50] sm:$0xff] }
   0x8   :  { %712 = vmatprep.subr.mxu1 %v89_v9  ;;  %v72_v15 = vld [vmem:[%s1349_s1 + $0x160] sm:$0xff]  ;;  %678 = vmatpush3.msra.mxu0 %v41_v10  ;;  %v71_v19 = vld [vmem:[%s1349_s1 + $0x158] sm:$0xff]  ;;  %v70_v23 = vld [vmem:[%s1349_s1 + $0x150] sm:$0xff] }
   0x9   :  { %713 = vmatpush3.msra.mxu1 %v73_v11  ;;  %679 = vmatprep.subr.mxu0 %v56_v12  ;;  %v53_v24 = vld [vmem:[%s1349_s1 + $0xc8] sm:$0xff]  ;;  %v52_v28 = vld [vmem:[%s1349_s1 + $0xc0] sm:$0xff]  ;;  %v51_v35 = vld [vmem:[%s1349_s1 + $0xb8] sm:$0xff] }
   0xa   :  { %714 = vmatprep.subr.mxu1 %v88_v13  ;;  %680 = vmatpush3.msra.mxu0 %v40_v14  ;;  %v85_v25 = vld [vmem:[%s1349_s1 + $0x1c8] sm:$0xff]  ;;  %v84_v29 = vld [vmem:[%s1349_s1 + $0x1c0] sm:$0xff]  ;;  %v83_v36 = vld [vmem:[%s1349_s1 + $0x1b8] sm:$0xff] }
   0xb   :  { %715 = vmatpush3.msra.mxu1 %v72_v15  ;;  %681 = vmatprep.subr.mxu0 %v55_v16  ;;  %v37_v26 = vld [vmem:[%s1349_s1 + $0x48] sm:$0xff]  ;;  %v36_v33 = vld [vmem:[%s1349_s1 + $0x40] sm:$0xff]  ;;  %v35_v37 = vld [vmem:[%s1349_s1 + $0x38] sm:$0xff] }
   0xc   :  { %716 = vmatprep.subr.mxu1 %v87_v17  ;;  %682 = vmatpush3.msra.mxu0 %v39_v18  ;;  %v69_v27 = vld [vmem:[%s1349_s1 + $0x148] sm:$0xff]  ;;  %v68_v34 = vld [vmem:[%s1349_s1 + $0x140] sm:$0xff]  ;;  %v67_v38 = vld [vmem:[%s1349_s1 + $0x138] sm:$0xff] }
   0xd   :  { %717 = vmatpush3.msra.mxu1 %v71_v19  ;;  %683 = vmatprep.subr.mxu0 %v54_v20  ;;  %v50_v39 = vld [vmem:[%s1349_s1 + $0xb0] sm:$0xff]  ;;  %v49_v45 = vld [vmem:[%s1349_s1 + $0xa8] sm:$0xff]  ;;  %v48_v49 = vld [vmem:[%s1349_s1 + $0xa0] sm:$0xff] }
   0xe   :  { %718 = vmatprep.subr.mxu1 %v86_v21  ;;  %684 = vmatpush3.msra.mxu0 %v38_v22  ;;  %v82_v40 = vld [vmem:[%s1349_s1 + $0x1b0] sm:$0xff]  ;;  %v81_v46 = vld [vmem:[%s1349_s1 + $0x1a8] sm:$0xff]  ;;  %v80_v50 = vld [vmem:[%s1349_s1 + $0x1a0] sm:$0xff] }
   0xf   :  { %719 = vmatpush3.msra.mxu1 %v70_v23  ;;  %685 = vmatprep.subr.mxu0 %v53_v24  ;;  %v34_v43 = vld [vmem:[%s1349_s1 + $0x30] sm:$0xff]  ;;  %v33_v47 = vld [vmem:[%s1349_s1 + $0x28] sm:$0xff]  ;;  %v32_v52 = vld [vmem:[%s1349_s1 + $0x20] sm:$0xff] }
  0x10   :  { %720 = vmatprep.subr.mxu1 %v85_v25  ;;  %686 = vmatpush3.msra.mxu0 %v37_v26  ;;  %v66_v44 = vld [vmem:[%s1349_s1 + $0x130] sm:$0xff]  ;;  %v65_v48 = vld [vmem:[%s1349_s1 + $0x128] sm:$0xff]  ;;  %v64_v53 = vld [vmem:[%s1349_s1 + $0x120] sm:$0xff] }
  0x11   :  { %721 = vmatpush3.msra.mxu1 %v69_v27  ;;  %687 = vmatprep.subr.mxu0 %v52_v28  ;;  %v26_v54 = vld [vmem:[%s1350_s0] sm:$0xff]  ;;  %v47_v55 = vld [vmem:[%s1349_s1 + $0x98] sm:$0xff]  ;;  %v46_v60 = vld [vmem:[%s1349_s1 + $0x90] sm:$0xff] }
  0x12   :  { %722 = vmatprep.subr.mxu1 %v84_v29  ;;  %688 = vmatpush3.msra.mxu0 %v36_v33  ;;  %v79_v56 = vld [vmem:[%s1349_s1 + $0x198] sm:$0xff]  ;;  %v165_v57 = vcombine.high %v26_v54, %v26_v54  ;;  %v78_v61 = vld [vmem:[%s1349_s1 + $0x190] sm:$0xff]  ;;  %v172_v62 = vrot.slane %v26_v54, %v1043_v51  ;;  %v45_v1 = vld [vmem:[%s1349_s1 + $0x88] sm:$0xff] }
  0x13   :  { %723 = vmatpush3.msra.mxu1 %v68_v34  ;;  %689 = vmatprep.subr.mxu0 %v51_v35  ;;  %v31_v58 = vld [vmem:[%s1349_s1 + $0x18] sm:$0xff]  ;;  %v30_v63 = vld [vmem:[%s1349_s1 + $0x10] sm:$0xff]  ;;  %v77_v2 = vld [vmem:[%s1349_s1 + $0x188] sm:$0xff] }
  0x14   :  { %724 = vmatprep.subr.mxu1 %v83_v36  ;;  %690 = vmatpush3.msra.mxu0 %v35_v37  ;;  %v63_v59 = vld [vmem:[%s1349_s1 + $0x118] sm:$0xff]  ;;  %v62_v0 = vld [vmem:[%s1349_s1 + $0x110] sm:$0xff]  ;;  %v179_v3 = vrot.slane %v165_v57, %v1043_v51  ;;  %v29_v4 = vld [vmem:[%s1349_s1 + $0x8] sm:$0xff]  ;;  %v180_v8 = vcombine.high %v172_v62, %v172_v62 }
  0x15   :  { %725 = vmatpush3.msra.mxu1 %v67_v38  ;;  %691 = vmatprep.subr.mxu0 %v50_v39  ;;  %v61_v5 = vld [vmem:[%s1349_s1 + $0x108] sm:$0xff]  ;;  %v44_v6 = vld [vmem:[%s1349_s1 + $0x80] sm:$0xff]  ;;  %v123_v12 = vld [vmem:[%s1349_s1 + $0x2f8] sm:$0xff] }
  0x16   :  { %726 = vmatprep.subr.mxu1 %v82_v40  ;;  %692 = vmatpush3.msra.mxu0 %v34_v43  ;;  %v76_v7 = vld [vmem:[%s1349_s1 + $0x180] sm:$0xff]  ;;  %v181_v11 = vcombine.high %v179_v3, %v179_v3  ;;  %v155_v13 = vld [vmem:[%s1349_s1 + $0x3f8] sm:$0xff]  ;;  %v122_v16 = vld [vmem:[%s1349_s1 + $0x2f0] sm:$0xff] }
  0x17   :  { %727 = vmatpush3.msra.mxu1 %v66_v44  ;;  %693 = vmatprep.subr.mxu0 %v49_v45  ;;  %v28_v9 = vld [vmem:[%s1349_s1] sm:$0xff]  ;;  %v107_v14 = vld [vmem:[%s1349_s1 + $0x278] sm:$0xff]  ;;  %v154_v17 = vld [vmem:[%s1349_s1 + $0x3f0] sm:$0xff] }
  0x18   :  { %728 = vmatprep.subr.mxu1 %v81_v46  ;;  %694 = vmatpush3.msra.mxu0 %v33_v47  ;;  %v60_v10 = vld [vmem:[%s1349_s1 + $0x100] sm:$0xff]  ;;  %v139_v15 = vld [vmem:[%s1349_s1 + $0x378] sm:$0xff]  ;;  %v106_v18 = vld [vmem:[%s1349_s1 + $0x270] sm:$0xff] }
  0x19   :  { %729 = vmatpush3.msra.mxu1 %v65_v48  ;;  %695 = vmatprep.subr.mxu0 %v48_v49  ;;  %v138_v19 = vld [vmem:[%s1349_s1 + $0x370] sm:$0xff]  ;;  %v121_v20 = vld [vmem:[%s1349_s1 + $0x2e8] sm:$0xff]  ;;  %v120_v24 = vld [vmem:[%s1349_s1 + $0x2e0] sm:$0xff] }
  0x1a   :  { %730 = vmatprep.subr.mxu1 %v80_v50  ;;  %696 = vmatpush3.msra.mxu0 %v32_v52  ;;  %v153_v21 = vld [vmem:[%s1349_s1 + $0x3e8] sm:$0xff]  ;;  %v152_v25 = vld [vmem:[%s1349_s1 + $0x3e0] sm:$0xff]  ;;  %v119_v28 = vld [vmem:[%s1349_s1 + $0x2d8] sm:$0xff] }
  0x1b   :  { %731 = vmatpush3.msra.mxu1 %v64_v53  ;;  %697 = vmatprep.subr.mxu0 %v47_v55  ;;  %v105_v22 = vld [vmem:[%s1349_s1 + $0x268] sm:$0xff]  ;;  %v104_v26 = vld [vmem:[%s1349_s1 + $0x260] sm:$0xff]  ;;  %v151_v29 = vld [vmem:[%s1349_s1 + $0x3d8] sm:$0xff] }
  0x1c   :  { %732 = vmatprep.subr.mxu1 %v79_v56  ;;  %698 = vmatpush3.msra.mxu0 %v31_v58  ;;  %v137_v23 = vld [vmem:[%s1349_s1 + $0x368] sm:$0xff]  ;;  %v136_v27 = vld [vmem:[%s1349_s1 + $0x360] sm:$0xff]  ;;  %v103_v30 = vld [vmem:[%s1349_s1 + $0x258] sm:$0xff] }
  0x1d   :  { %733 = vmatpush3.msra.mxu1 %v63_v59  ;;  %699 = vmatprep.subr.mxu0 %v46_v60  ;;  %v135_v31 = vld [vmem:[%s1349_s1 + $0x358] sm:$0xff]  ;;  %v118_v32 = vld [vmem:[%s1349_s1 + $0x2d0] sm:$0xff]  ;;  %v117_v36 = vld [vmem:[%s1349_s1 + $0x2c8] sm:$0xff] }
  0x1e   :  { %734 = vmatprep.subr.mxu1 %v78_v61  ;;  %700 = vmatpush3.msra.mxu0 %v30_v63  ;;  %v150_v33 = vld [vmem:[%s1349_s1 + $0x3d0] sm:$0xff]  ;;  %v149_v37 = vld [vmem:[%s1349_s1 + $0x3c8] sm:$0xff]  ;;  %v116_v40 = vld [vmem:[%s1349_s1 + $0x2c0] sm:$0xff] }
  0x1f   :  { %735 = vmatpush3.msra.mxu1 %v62_v0  ;;  %701 = vmatprep.subr.mxu0 %v45_v1  ;;  %v102_v34 = vld [vmem:[%s1349_s1 + $0x250] sm:$0xff]  ;;  %v101_v38 = vld [vmem:[%s1349_s1 + $0x248] sm:$0xff]  ;;  %v148_v41 = vld [vmem:[%s1349_s1 + $0x3c0] sm:$0xff] }
  0x20   :  { %736 = vmatprep.subr.mxu1 %v77_v2  ;;  %702 = vmatpush3.msra.mxu0 %v29_v4  ;;  %v134_v35 = vld [vmem:[%s1349_s1 + $0x350] sm:$0xff]  ;;  %v133_v39 = vld [vmem:[%s1349_s1 + $0x348] sm:$0xff]  ;;  %v100_v42 = vld [vmem:[%s1349_s1 + $0x240] sm:$0xff] }
  0x21   :  { %737 = vmatpush3.msra.mxu1 %v61_v5  ;;  %703 = vmatprep.subr.mxu0 %v44_v6  ;;  %v132_v43 = vld [vmem:[%s1349_s1 + $0x340] sm:$0xff]  ;;  %v115_v44 = vld [vmem:[%s1349_s1 + $0x2b8] sm:$0xff]  ;;  %v114_v48 = vld [vmem:[%s1349_s1 + $0x2b0] sm:$0xff] }
  0x22   :  { %738 = vmatprep.subr.mxu1 %v76_v7  ;;  %704 = vmatpush3.msra.mxu0 %v28_v9  ;;  %v147_v45 = vld [vmem:[%s1349_s1 + $0x3b8] sm:$0xff]  ;;  %v146_v49 = vld [vmem:[%s1349_s1 + $0x3b0] sm:$0xff]  ;;  %v27_v53 = vld [vmem:[%s1350_s0 + $0x8] sm:$0xff] }
  0x23   :  { %271 = vmatprep.mubr.f32.mxu0 %v180_v8  ;;  %739 = vmatpush3.msra.mxu1 %v60_v10  ;;  %v99_v46 = vld [vmem:[%s1349_s1 + $0x238] sm:$0xff]  ;;  %v98_v50 = vld [vmem:[%s1349_s1 + $0x230] sm:$0xff]  ;;  %v113_v54 = vld [vmem:[%s1349_s1 + $0x2a8] sm:$0xff]  ;;  %v182_v60 = vcombine.high %v27_v53, %v27_v53  ;;  %v189_v5 = vrot.slane %v27_v53, %v1043_v51 }
  0x24   :  { %272 = vmatmul.mubr.f32.vlgmr.msra.gmra.mxu0 %v172_v62  ;;  %341 = vmatprep.mubr.f32.mxu1 %v181_v11  ;;  %v131_v47 = vld [vmem:[%s1349_s1 + $0x338] sm:$0xff]  ;;  %v130_v52 = vld [vmem:[%s1349_s1 + $0x330] sm:$0xff]  ;;  %v145_v55 = vld [vmem:[%s1349_s1 + $0x3a8] sm:$0xff] }
  0x25   :  { %743 = vmatprep.subr.mxu0 %v123_v12  ;;  %778 = vmatprep.subr.mxu1 %v155_v13  ;;  %v97_v56 = vld [vmem:[%s1349_s1 + $0x228] sm:$0xff]  ;;  %v112_v58 = vld [vmem:[%s1349_s1 + $0x2a0] sm:$0xff]  ;;  %v111_v63 = vld [vmem:[%s1349_s1 + $0x298] sm:$0xff]  ;;  %v196_v8 = vrot.slane %v182_v60, %v1043_v51 }
  0x26   :  { %342 = vmatmul.mubr.f32.vlgmr.msra.gmra.mxu1 %v179_v3  ;;  %744 = vmatpush3.msra.mxu0 %v107_v14  ;;  %v129_v57 = vld [vmem:[%s1349_s1 + $0x328] sm:$0xff]  ;;  %v144_v59 = vld [vmem:[%s1349_s1 + $0x3a0] sm:$0xff]  ;;  %v143_v0 = vld [vmem:[%s1349_s1 + $0x398] sm:$0xff]  ;;  %v197_v14 = vcombine.high %v189_v5, %v189_v5 }
  0x27   :  { %779 = vmatpush3.msra.mxu1 %v139_v15  ;;  %745 = vmatprep.subr.mxu0 %v122_v16  ;;  %v96_v61 = vld [vmem:[%s1349_s1 + $0x220] sm:$0xff]  ;;  %v95_v1 = vld [vmem:[%s1349_s1 + $0x218] sm:$0xff]  ;;  %v110_v3 = vld [vmem:[%s1349_s1 + $0x290] sm:$0xff]  ;;  %v198_v16 = vcombine.high %v196_v8, %v196_v8 }
  0x28   :  { %780 = vmatprep.subr.mxu1 %v154_v17  ;;  %746 = vmatpush3.msra.mxu0 %v106_v18  ;;  %v128_v62 = vld [vmem:[%s1349_s1 + $0x320] sm:$0xff]  ;;  %v127_v2 = vld [vmem:[%s1349_s1 + $0x318] sm:$0xff]  ;;  %v142_v4 = vld [vmem:[%s1349_s1 + $0x390] sm:$0xff]  ;;  %v863_v18 = vmov 0.0  }
  0x29   :  { %781 = vmatpush3.msra.mxu1 %v138_v19  ;;  %747 = vmatprep.subr.mxu0 %v121_v20  ;;  %v94_v6 = vld [vmem:[%s1349_s1 + $0x210] sm:$0xff]  ;;  %v109_v9 = vld [vmem:[%s1349_s1 + $0x288] sm:$0xff]  ;;  %v108_v12 = vld [vmem:[%s1349_s1 + $0x280] sm:$0xff] }
  0x2a   :  { %782 = vmatprep.subr.mxu1 %v153_v21  ;;  %748 = vmatpush3.msra.mxu0 %v105_v22  ;;  %v126_v7 = vld [vmem:[%s1349_s1 + $0x310] sm:$0xff]  ;;  %v141_v10 = vld [vmem:[%s1349_s1 + $0x388] sm:$0xff]  ;;  %v140_v13 = vld [vmem:[%s1349_s1 + $0x380] sm:$0xff] }
  0x2b   :  { %783 = vmatpush3.msra.mxu1 %v137_v23  ;;  %749 = vmatprep.subr.mxu0 %v120_v24  ;;  %v93_v11 = vld [vmem:[%s1349_s1 + $0x208] sm:$0xff]  ;;  %v92_v15 = vld [vmem:[%s1349_s1 + $0x200] sm:$0xff]  ;;  %v491_v19 = vld [vmem:[%s1351_s3 + $0x18] sm:$0xff] }
  0x2c   :  { %784 = vmatprep.subr.mxu1 %v152_v25  ;;  %750 = vmatpush3.msra.mxu0 %v104_v26  ;;  %v125_v51 = vld [vmem:[%s1349_s1 + $0x308] sm:$0xff]  ;;  %v124_v17 = vld [vmem:[%s1349_s1 + $0x300] sm:$0xff]  ;;  %v490_v20 = vld [vmem:[%s1351_s3 + $0x10] sm:$0xff] }
  0x2d   :  { %785 = vmatpush3.msra.mxu1 %v136_v27  ;;  %751 = vmatprep.subr.mxu0 %v119_v28  ;;  %v489_v21 = vld [vmem:[%s1351_s3 + $0x8] sm:$0xff]  ;;  %v488_v22 = vld [vmem:[%s1351_s3] sm:$0xff]  ;;  %v581_v23 = vld [vmem:[%s1352_s5 + $0x38] sm:$0xff] }
  0x2e   :  { %786 = vmatprep.subr.mxu1 %v151_v29  ;;  %752 = vmatpush3.msra.mxu0 %v103_v30  ;;  %v580_v24 = vld [vmem:[%s1352_s5 + $0x30] sm:$0xff]  ;;  %v579_v25 = vld [vmem:[%s1352_s5 + $0x28] sm:$0xff]  ;;  %v578_v26 = vld [vmem:[%s1352_s5 + $0x20] sm:$0xff] }
  0x2f   :  { %787 = vmatpush3.msra.mxu1 %v135_v31  ;;  %753 = vmatprep.subr.mxu0 %v118_v32  ;;  %v577_v27 = vld [vmem:[%s1352_s5 + $0x18] sm:$0xff]  ;;  %v668_v32 = vld [vmem:[%s1353_s2] ss:$0 sm:$0xff] }
  0x30   :  { %788 = vmatprep.subr.mxu1 %v150_v33  ;;  %754 = vmatpush3.msra.mxu0 %v102_v34 }
  0x31   :  { %789 = vmatpush3.msra.mxu1 %v134_v35  ;;  %755 = vmatprep.subr.mxu0 %v117_v36 }
  0x32   :  { %790 = vmatprep.subr.mxu1 %v149_v37  ;;  %756 = vmatpush3.msra.mxu0 %v101_v38 }
  0x33   :  { %791 = vmatpush3.msra.mxu1 %v133_v39  ;;  %757 = vmatprep.subr.mxu0 %v116_v40 }
  0x34   :  { %792 = vmatprep.subr.mxu1 %v148_v41  ;;  %758 = vmatpush3.msra.mxu0 %v100_v42 }
  0x35   :  { %793 = vmatpush3.msra.mxu1 %v132_v43  ;;  %759 = vmatprep.subr.mxu0 %v115_v44 }
  0x36   :  { %794 = vmatprep.subr.mxu1 %v147_v45  ;;  %760 = vmatpush3.msra.mxu0 %v99_v46  ;;  %v576_v46 = vld [vmem:[%s1352_s5 + $0x10] sm:$0xff] }
  0x37   :  { %795 = vmatpush3.msra.mxu1 %v131_v47  ;;  %761 = vmatprep.subr.mxu0 %v114_v48  ;;  %v575_v47 = vld [vmem:[%s1352_s5 + $0x8] sm:$0xff]  ;;  %v574_v48 = vld [vmem:[%s1352_s5] sm:$0xff] }
  0x38   :  { %796 = vmatprep.subr.mxu1 %v146_v49  ;;  %762 = vmatpush3.msra.mxu0 %v98_v50  ;;  %v669_v49 = vld [vmem:[%s1354_s4] ss:$0 sm:$0xff] }
  0x39   :  { %797 = vmatpush3.msra.mxu1 %v130_v52  ;;  %763 = vmatprep.subr.mxu0 %v113_v54 }
  0x3a   :  { %798 = vmatprep.subr.mxu1 %v145_v55  ;;  %764 = vmatpush3.msra.mxu0 %v97_v56  ;;  %v671_v55 = vld [vmem:[%s1355_s6] ss:$0 sm:$0xff] }
  0x3b   :  { %799 = vmatpush3.msra.mxu1 %v129_v57  ;;  %765 = vmatprep.subr.mxu0 %v112_v58 }
  0x3c   :  { %800 = vmatprep.subr.mxu1 %v144_v59  ;;  %766 = vmatpush3.msra.mxu0 %v96_v61 }
  0x3d   :  { %801 = vmatpush3.msra.mxu1 %v128_v62  ;;  %767 = vmatprep.subr.mxu0 %v111_v63 }
  0x3e   :  { %802 = vmatprep.subr.mxu1 %v143_v0  ;;  %768 = vmatpush3.msra.mxu0 %v95_v1 }
  0x3f   :  { %803 = vmatpush3.msra.mxu1 %v127_v2  ;;  %769 = vmatprep.subr.mxu0 %v110_v3 }
  0x40   :  { %804 = vmatprep.subr.mxu1 %v142_v4  ;;  %770 = vmatpush3.msra.mxu0 %v94_v6 }
  0x41   :  { %805 = vmatpush3.msra.mxu1 %v126_v7  ;;  %771 = vmatprep.subr.mxu0 %v109_v9 }
  0x42   :  { %806 = vmatprep.subr.mxu1 %v141_v10  ;;  %772 = vmatpush3.msra.mxu0 %v93_v11 }
  0x43   :  { %807 = vmatpush3.msra.mxu1 %v125_v51  ;;  %773 = vmatprep.subr.mxu0 %v108_v12 }
  0x44   :  { %808 = vmatprep.subr.mxu1 %v140_v13  ;;  %774 = vmatpush3.msra.mxu0 %v92_v15 }
  0x45   :  { %411 = vmatprep.mubr.f32.mxu0 %v197_v14  ;;  %809 = vmatpush3.msra.mxu1 %v124_v17 }
  0x46   :  { %481 = vmatprep.mubr.f32.mxu1 %v198_v16  ;;  %412 = vmatmul.mubr.f32.vlgmr.msra.gmra.mxu0 %v189_v5 }
  0x47   :  { %482 = vmatmul.mubr.f32.vlgmr.msra.gmra.mxu1 %v196_v8  ;;  %827 = vmatprep.subr.mxu0 %v863_v18 }
  0x48   :  { %838 = vmatprep.subr.mxu1 %v863_v18  ;;  %828 = vmatpush3.msra.mxu0 %v491_v19 }
  0x49   :  { %829 = vmatprep.subr.mxu0 %v863_v18  ;;  %835 = vmatprep.mubr.msk.f32.mxu0 %vm864_vm0, %v863_v18 }
  0x4a   :  { %830 = vmatpush3.msra.mxu0 %v490_v20  ;;  %854 = vmatprep.mubr.msk.f32.mxu1 %vm864_vm0, %v863_v18 }
  0x4b   :  { %831 = vmatprep.subr.mxu0 %v863_v18  ;;  %839 = vmatpush3.msra.mxu1 %v581_v23 }
  0x4c   :  { %832 = vmatpush3.msra.mxu0 %v489_v21  ;;  %840 = vmatprep.subr.mxu1 %v863_v18 }
  0x4d   :  { %833 = vmatprep.subr.mxu0 %v863_v18  ;;  %841 = vmatpush3.msra.mxu1 %v580_v24 }
  0x4e   :  { %834 = vmatpush3.msra.mxu0 %v488_v22  ;;  %842 = vmatprep.subr.mxu1 %v863_v18 }
  0x4f   :  { %843 = vmatpush3.msra.mxu1 %v579_v25 }
  0x50   :  { %844 = vmatprep.subr.mxu1 %v863_v18 }
  0x51   :  { %845 = vmatpush3.msra.mxu1 %v578_v26 }
  0x52   :  { %846 = vmatprep.subr.mxu1 %v863_v18 }
  0x53   :  { %847 = vmatpush3.msra.mxu1 %v577_v27 }
  0x54   :  { %848 = vmatprep.subr.mxu1 %v863_v18 }
  0x55   :  { %849 = vmatpush3.msra.mxu1 %v576_v46 }
  0x56   :  { %850 = vmatprep.subr.mxu1 %v863_v18 }
  0x57   :  { %851 = vmatpush3.msra.mxu1 %v575_v47 }
  0x58   :  { %852 = vmatprep.subr.mxu1 %v863_v18 }
  0x59   :  { %853 = vmatpush3.msra.mxu1 %v574_v48 }
  0xe4   :  { %v705_v28 = vpop.f32.mrf.mxu0 }
  0xe6   :  { %v740_v29 = vpop.f32.mrf.mxu1  ;;  %v706_v30 = vpop.f32.mrf.mxu0 }
  0xe7   :  { %v707_v31 = vadd.f32 %v706_v30, %v705_v28 }
  0xe8   :  { %v741_v33 = vpop.f32.mrf.mxu1 }
  0xe9   :  { %v274_v34 = vadd.f32 %v707_v31, %v668_v32  ;;  %v742_v35 = vadd.f32 %v741_v33, %v740_v29 }
  0xeb   :  { %v344_v40 = vadd.f32 %v742_v35, %v274_v34 }
 0x106   :  { %v775_v36 = vpop.f32.mrf.mxu0 }
 0x107   :  { %v810_v37 = vpop.f32.mrf.mxu1 }
 0x108   :  { %v776_v38 = vpop.f32.mrf.mxu0 }
 0x109   :  { %v811_v39 = vpop.f32.mrf.mxu1  ;;  %v777_v41 = vadd.f32 %v776_v38, %v775_v36 }
 0x10a   :  { %v812_v43 = vadd.f32 %v811_v39, %v810_v37 }
 0x10b   :  { %v414_v42 = vadd.f32 %v777_v41, %v344_v40 }
 0x10d   :  { %v484_v44 = vadd.f32 %v812_v43, %v414_v42 }
 0x10f   :  { %v487_v45 = vmax.f32 %v484_v44, 0.0 }
 0x111   :  { %836 = vmatmul.mubr.msk.f32.vlgmr.msra.gmra.mxu0 %vm499_vm1, %v487_v45 }
 0x1d1   :  { %v569_v50 = vpop.f32.mrf.mxu0 }
 0x1d2   :  { %v570_v52 = vadd.f32 %v669_v49, %v569_v50 }
 0x1d3   :  { %v837_v53 = vpop.f32.mrf.mxu0 }
 0x1d4   :  { %v573_v54 = vmax.f32 %v570_v52, 0.0 }
 0x1d6   :  { %855 = vmatmul.mubr.msk.f32.vlgmr.msra.gmra.mxu1 %vm589_vm2, %v573_v54 }
 0x296   :  { %v659_v56 = vpop.f32.mrf.mxu1 }
 0x297   :  { %v660_v57 = vadd.f32 %v671_v55, %v659_v56 }
 0x298   :  { %v856_v58 = vpop.f32.mrf.mxu1 }
 0x299   :  { %663 = vst [vmem:[%s1356_s7] sm:$0x3] %v660_v57 }

</bundles_post_ra>
